<compile_context>
chip_gen: v7x
topology: tpu7x:2x2x1
jax: 0.10.0
libtpu: 0.0.40
codegen_flags: <defaults>
</compile_context>

<pallas_src>
import jax
import jax.numpy as jnp
from jax.experimental import pallas as pl
from jax.experimental.pallas import tpu as pltpu

LANE = 128
SUBLANE = 8


def _round_up(x, m):
    return ((x + m - 1) // m) * m


def mlp_kernel(x_ref, w1_ref, b1_ref, w2_ref, b2_ref, w3_ref, b3_ref, o_ref):
    # Cast the activation in-kernel (no-op for f32 weights); MXU accumulates in f32.
    x = x_ref[...].astype(w1_ref.dtype)
    # Layer 1: Linear(d_in -> 128) + ReLU   (bias-add / ReLU in f32)
    h = jnp.dot(x, w1_ref[...], preferred_element_type=jnp.float32)
    h = jnp.maximum(h + b1_ref[...], 0.0)
    # Layer 2: Linear(128 -> 64) + ReLU
    h = jnp.dot(h.astype(w2_ref.dtype), w2_ref[...], preferred_element_type=jnp.float32)
    h = jnp.maximum(h + b2_ref[...], 0.0)
    # Layer 3: Linear(64 -> d_out)
    y = jnp.dot(h.astype(w3_ref.dtype), w3_ref[...], preferred_element_type=jnp.float32)
    o_ref[...] = (y + b3_ref[...]).astype(o_ref.dtype)


def model_a_forward(x, params, *, compute_dtype=jnp.float32, tile_b=2048):
    """x: (B, input_dim). params: dict w1,b1,w2,b2,w3,b3 (biases shaped (1, n)).

    compute_dtype: dtype for the (tiny, VMEM-resident) weights / MXU operands.  x is read in
    its own dtype and cast inside the kernel; biases and elementwise math stay f32.
    """
    w1, b1, w2, b2, w3, b3 = (
        params["w1"], params["b1"], params["w2"],
        params["b2"], params["w3"], params["b3"],
    )
    B, d_in = x.shape
    h1 = w1.shape[1]
    h2 = w2.shape[1]
    d_out = w3.shape[1]

    # Batch tile: big enough to amortize per-step overhead, but at least 2 grid tiles when B
    # allows it (keeps both v7x TensorCores busy); always a multiple of 8 sublanes.
    tb = min(tile_b, max(SUBLANE, _round_up(pl.cdiv(B, 2), SUBLANE)))
    n_tiles = pl.cdiv(B, tb)

    # Weights: cast once (≈100 KB total, negligible).  Biases stay f32.
    w1c = w1.astype(compute_dtype)
    w2c = w2.astype(compute_dtype)
    w3c = w3.astype(compute_dtype)
    b1f = b1.astype(jnp.float32)
    b2f = b2.astype(jnp.float32)
    b3f = b3.astype(jnp.float32)

    const = lambda i: (0, 0)  # weights/biases resident across grid steps (never re-DMA'd)

    # VMEM budget: double-buffered x/out tiles (lane layout pads last dim to 128 in VMEM)
    # + intermediate activations + weights, with margin.  Clamp to fit v7x's 64 MiB physical.
    x_blk = tb * _round_up(d_in, LANE) * jnp.dtype(x.dtype).itemsize
    o_blk = tb * _round_up(d_out, LANE) * 4
    inter = 3 * tb * LANE * 4
    vmem_bytes = 2 * (x_blk + o_blk) + inter + (4 << 20)
    vmem_bytes = int(min(max(vmem_bytes, 16 << 20), 48 << 20))

    cost = pl.CostEstimate(
        flops=2 * B * (d_in * h1 + h1 * h2 + h2 * d_out),
        transcendentals=0,
        bytes_accessed=int(
            B * (d_in * jnp.dtype(x.dtype).itemsize + d_out * 4)
            + (d_in * h1 + h1 * h2 + h2 * d_out) * jnp.dtype(compute_dtype).itemsize
            + (h1 + h2 + d_out) * 4
        ),
    )

    out = pl.pallas_call(
        mlp_kernel,
        out_shape=jax.ShapeDtypeStruct((B, d_out), jnp.float32),
        grid_spec=pltpu.PrefetchScalarGridSpec(
            num_scalar_prefetch=0,
            grid=(n_tiles,),
            in_specs=[
                pl.BlockSpec((tb, d_in), lambda i: (i, 0)),  # x tiled over batch, unpadded
                pl.BlockSpec((d_in, h1), const),
                pl.BlockSpec((1, h1), const),
                pl.BlockSpec((h1, h2), const),
                pl.BlockSpec((1, h2), const),
                pl.BlockSpec((h2, d_out), const),
                pl.BlockSpec((1, d_out), const),
            ],
            out_specs=pl.BlockSpec((tb, d_out), lambda i: (i, 0)),  # unpadded (B, 10) output
        ),
        compiler_params=pltpu.CompilerParams(
            dimension_semantics=("parallel",),  # batch tiles shard across TCs (v7x megacore)
            vmem_limit_bytes=vmem_bytes,
        ),
        cost_estimate=cost,
    )(x, w1c, b1f, w2c, b2f, w3c, b3f)

    return out


def init_params(key, input_dim=90, output_dim=10):
    """Deterministic init mimicking nn.Linear default U(-1/sqrt(fan_in), +1/sqrt(fan_in))."""
    dims = [(input_dim, 128), (128, 64), (64, output_dim)]
    params = {}
    for i, (fan_in, fan_out) in enumerate(dims, start=1):
        key, kw, kb = jax.random.split(key, 3)
        bound = 1.0 / (fan_in ** 0.5)
        params[f"w{i}"] = jax.random.uniform(
            kw, (fan_in, fan_out), jnp.float32, -bound, bound)
        params[f"b{i}"] = jax.random.uniform(
            kb, (1, fan_out), jnp.float32, -bound, bound)
    return params


def reference_forward(x, params):
    h = jnp.maximum(x @ params["w1"] + params["b1"], 0.0)
    h = jnp.maximum(h @ params["w2"] + params["b2"], 0.0)
    return h @ params["w3"] + params["b3"]


if __name__ == "__main__":
    key = jax.random.PRNGKey(0)
    k_param, k_x1, k_x2 = jax.random.split(key, 3)

    input_dim, output_dim = 90, 10
    params = init_params(k_param, input_dim=input_dim, output_dim=output_dim)

    # Small batch, single grid step, f32.
    x_small = jax.random.normal(k_x1, (8, input_dim), jnp.float32)
    out_small = jax.block_until_ready(model_a_forward(x_small, params))
    ref_small = reference_forward(x_small, params)
    assert out_small.shape == (8, output_dim)
    assert jnp.allclose(out_small, ref_small, atol=1e-4, rtol=1e-4)

    # Non-multiple batch with an explicit small tile -> 2 grid steps, partial last block, f32.
    x_big = jax.random.normal(k_x2, (20, input_dim), jnp.float32)
    out_big = jax.block_until_ready(model_a_forward(x_big, params, tile_b=16))
    ref_big = reference_forward(x_big, params)
    assert out_big.shape == (20, output_dim)
    assert jnp.allclose(out_big, ref_big, atol=1e-4, rtol=1e-4)

    # bf16-weight / f32-accumulation path (x stays f32, cast in-kernel); looser tolerance.
    out_bf16 = jax.block_until_ready(
        model_a_forward(x_big, params, compute_dtype=jnp.bfloat16, tile_b=16))
    assert out_bf16.shape == (20, output_dim)
    assert jnp.allclose(out_bf16, ref_big, atol=5e-2, rtol=5e-2)

    print("KERNEL_OK")
</pallas_src>

<mosaic_0001>
module attributes {stable_mosaic.version = 11 : i64} {
  func.func @mlp_kernel(%arg0: i32, %arg1: memref<8x90xf32, #tpu.memory_space<vmem>>, %arg2: memref<90x128xf32, #tpu.memory_space<vmem>>, %arg3: memref<1x128xf32, #tpu.memory_space<vmem>>, %arg4: memref<128x64xf32, #tpu.memory_space<vmem>>, %arg5: memref<1x64xf32, #tpu.memory_space<vmem>>, %arg6: memref<64x10xf32, #tpu.memory_space<vmem>>, %arg7: memref<1x10xf32, #tpu.memory_space<vmem>>, %arg8: memref<8x10xf32, #tpu.memory_space<vmem>>) attributes {dimension_semantics = [#tpu.dimension_semantics<parallel>], iteration_bounds = array<i64: 1>, scalar_prefetch = 0 : i64, scratch_operands = 0 : i64, tpu.core_type = #tpu.core_type<tc>, window_params = [{transform_indices = @transform_0, window_bounds = array<i64: 8, 90>}, {pipeline_mode = #tpu.pipeline_mode<synchronous>, transform_indices = @transform_1, window_bounds = array<i64: 90, 128>}, {pipeline_mode = #tpu.pipeline_mode<synchronous>, transform_indices = @transform_2, window_bounds = array<i64: 1, 128>}, {pipeline_mode = #tpu.pipeline_mode<synchronous>, transform_indices = @transform_3, window_bounds = array<i64: 128, 64>}, {pipeline_mode = #tpu.pipeline_mode<synchronous>, transform_indices = @transform_4, window_bounds = array<i64: 1, 64>}, {pipeline_mode = #tpu.pipeline_mode<synchronous>, transform_indices = @transform_5, window_bounds = array<i64: 64, 10>}, {pipeline_mode = #tpu.pipeline_mode<synchronous>, transform_indices = @transform_6, window_bounds = array<i64: 1, 10>}, {transform_indices = @transform_7, window_bounds = array<i64: 8, 10>}]} {
    %c0 = arith.constant 0 : index
    %c0_0 = arith.constant 0 : index
    %0 = vector.load %arg1[%c0, %c0_0] : memref<8x90xf32, #tpu.memory_space<vmem>>, vector<8x90xf32>
    %c0_1 = arith.constant 0 : index
    %c0_2 = arith.constant 0 : index
    %1 = vector.load %arg2[%c0_1, %c0_2] : memref<90x128xf32, #tpu.memory_space<vmem>>, vector<90x128xf32>
    %cst = arith.constant dense<0.000000e+00> : vector<8x128xf32>
    %2 = tpu.matmul %0, %1, %cst {dimension_numbers = #tpu.dot_dimension_numbers<[1], [0], [0], [1], [0, 0, 1, 1], [], []>} : vector<8x90xf32>, vector<90x128xf32>, vector<8x128xf32> -> vector<8x128xf32>
    %c0_3 = arith.constant 0 : index
    %c0_4 = arith.constant 0 : index
    %3 = vector.load %arg3[%c0_3, %c0_4] : memref<1x128xf32, #tpu.memory_space<vmem>>, vector<1x128xf32>
    %4 = vector.broadcast %3 : vector<1x128xf32> to vector<8x128xf32>
    %5 = arith.addf %2, %4 : vector<8x128xf32>
    %cst_5 = arith.constant 0.000000e+00 : f32
    %6 = vector.broadcast %cst_5 : f32 to vector<8x128xf32>
    %7 = arith.maximumf %5, %6 : vector<8x128xf32>
    %c0_6 = arith.constant 0 : index
    %c0_7 = arith.constant 0 : index
    %8 = vector.load %arg4[%c0_6, %c0_7] : memref<128x64xf32, #tpu.memory_space<vmem>>, vector<128x64xf32>
    %cst_8 = arith.constant dense<0.000000e+00> : vector<8x64xf32>
    %9 = tpu.matmul %7, %8, %cst_8 {dimension_numbers = #tpu.dot_dimension_numbers<[1], [0], [0], [1], [0, 0, 1, 1], [], []>} : vector<8x128xf32>, vector<128x64xf32>, vector<8x64xf32> -> vector<8x64xf32>
    %c0_9 = arith.constant 0 : index
    %c0_10 = arith.constant 0 : index
    %10 = vector.load %arg5[%c0_9, %c0_10] : memref<1x64xf32, #tpu.memory_space<vmem>>, vector<1x64xf32>
    %11 = vector.broadcast %10 : vector<1x64xf32> to vector<8x64xf32>
    %12 = arith.addf %9, %11 : vector<8x64xf32>
    %cst_11 = arith.constant 0.000000e+00 : f32
    %13 = vector.broadcast %cst_11 : f32 to vector<8x64xf32>
    %14 = arith.maximumf %12, %13 : vector<8x64xf32>
    %c0_12 = arith.constant 0 : index
    %c0_13 = arith.constant 0 : index
    %15 = vector.load %arg6[%c0_12, %c0_13] : memref<64x10xf32, #tpu.memory_space<vmem>>, vector<64x10xf32>
    %cst_14 = arith.constant dense<0.000000e+00> : vector<8x10xf32>
    %16 = tpu.matmul %14, %15, %cst_14 {dimension_numbers = #tpu.dot_dimension_numbers<[1], [0], [0], [1], [0, 0, 1, 1], [], []>} : vector<8x64xf32>, vector<64x10xf32>, vector<8x10xf32> -> vector<8x10xf32>
    %c0_15 = arith.constant 0 : index
    %c0_16 = arith.constant 0 : index
    %17 = vector.load %arg7[%c0_15, %c0_16] : memref<1x10xf32, #tpu.memory_space<vmem>>, vector<1x10xf32>
    %18 = vector.broadcast %17 : vector<1x10xf32> to vector<8x10xf32>
    %19 = arith.addf %16, %18 : vector<8x10xf32>
    %c0_17 = arith.constant 0 : index
    %c0_18 = arith.constant 0 : index
    %20 = vector.load %arg8[%c0_17, %c0_18] : memref<8x10xf32, #tpu.memory_space<vmem>>, vector<8x10xf32>
    tpu.vector_store %arg8[%c0_17, %c0_18], %19 {strides = array<i32>} : memref<8x10xf32, #tpu.memory_space<vmem>>, vector<8x10xf32>,
    return
  }
  func.func @transform_0(%arg0: i32) -> (i32, i32) {
    %c0_i32 = arith.constant 0 : i32
    %c0_i32_0 = arith.constant 0 : i32
    return %arg0, %c0_i32 : i32, i32
  }
  func.func @transform_1(%arg0: i32) -> (i32, i32) {
    %c0_i32 = arith.constant 0 : i32
    %c0_i32_0 = arith.constant 0 : i32
    %c0_i32_1 = arith.constant 0 : i32
    return %c0_i32, %c0_i32_0 : i32, i32
  }
  func.func @transform_2(%arg0: i32) -> (i32, i32) {
    %c0_i32 = arith.constant 0 : i32
    %c0_i32_0 = arith.constant 0 : i32
    %c0_i32_1 = arith.constant 0 : i32
    return %c0_i32, %c0_i32_0 : i32, i32
  }
  func.func @transform_3(%arg0: i32) -> (i32, i32) {
    %c0_i32 = arith.constant 0 : i32
    %c0_i32_0 = arith.constant 0 : i32
    %c0_i32_1 = arith.constant 0 : i32
    return %c0_i32, %c0_i32_0 : i32, i32
  }
  func.func @transform_4(%arg0: i32) -> (i32, i32) {
    %c0_i32 = arith.constant 0 : i32
    %c0_i32_0 = arith.constant 0 : i32
    %c0_i32_1 = arith.constant 0 : i32
    return %c0_i32, %c0_i32_0 : i32, i32
  }
  func.func @transform_5(%arg0: i32) -> (i32, i32) {
    %c0_i32 = arith.constant 0 : i32
    %c0_i32_0 = arith.constant 0 : i32
    %c0_i32_1 = arith.constant 0 : i32
    return %c0_i32, %c0_i32_0 : i32, i32
  }
  func.func @transform_6(%arg0: i32) -> (i32, i32) {
    %c0_i32 = arith.constant 0 : i32
    %c0_i32_0 = arith.constant 0 : i32
    %c0_i32_1 = arith.constant 0 : i32
    return %c0_i32, %c0_i32_0 : i32, i32
  }
  func.func @transform_7(%arg0: i32) -> (i32, i32) {
    %c0_i32 = arith.constant 0 : i32
    %c0_i32_0 = arith.constant 0 : i32
    return %arg0, %c0_i32 : i32, i32
  }
}

</mosaic_0001>

<bundles_post_ra>
// kernel: tpu_custom_call.1
= control target key start
LH: loop header
LB: loop body
LE: loop exit
PB: predicated region body
PF: predicated region fallthrough
CT: control target
= control target key end

     0   :  { %v535_v3 = vmov 0.0|0.0   ;;  %vm536_vm0 = vmmov 0   ;;  %v537_v6 = vmov 0.0   ;;  %s736_s0 = inlined_call_operand.vmem [shape: f32[8,90], index: 0, kind: input, shape index: {}]   ;;  %s737_s1 = inlined_call_operand.vmem [shape: f32[90,128], index: 1, kind: input, shape index: {}]   ;;  %s738_s2 = inlined_call_operand.vmem [shape: f32[1,128], index: 2, kind: input, shape index: {}]   ;;  %s739_s3 = inlined_call_operand.vmem [shape: f32[128,64], index: 3, kind: input, shape index: {}]   ;;  %s740_s4 = inlined_call_operand.vmem [shape: f32[1,64], index: 4, kind: input, shape index: {}]   ;;  %s741_s5 = inlined_call_operand.vmem [shape: f32[64,10], index: 5, kind: input, shape index: {}]   ;;  %s742_s6 = inlined_call_operand.vmem [shape: f32[1,10], index: 6, kind: input, shape index: {}]   ;;  %s743_s7 = inlined_call_operand.hbm [shape: f32[8,10], index: 7, kind: output, shape index: {}]  }
   0x1   :  { %v28_v0 = vld [vmem:[%s737_s1] sm:$0xff]  ;;  %v29_v1 = vld [vmem:[%s737_s1 + $0x8] sm:$0xff]  ;;  %v30_v2 = vld [vmem:[%s737_s1 + $0x10] sm:$0xff]  ;;  %451 = vmatprep.subr.bf16.mxu0 %v535_v3  ;;  %470 = vmatprep.subr.bf16.mxu1 %v535_v3 }
   0x2   :  { %v452_v4 = vpack.c.bf16 %v29_v1, %v28_v0  ;;  %v31_v5 = vld [vmem:[%s737_s1 + $0x18] sm:$0xff]  ;;  %394 = vmatprep.mubr.msk.f32.mxu0 %vm536_vm0, %v537_v6  ;;  %429 = vmatprep.mubr.msk.f32.mxu1 %vm536_vm0, %v537_v6  ;;  %v32_v8 = vld [vmem:[%s737_s1 + $0x20] sm:$0xff]  ;;  %v33_v9 = vld [vmem:[%s737_s1 + $0x28] sm:$0xff] }
   0x3   :  { %v455_v7 = vpack.c.bf16 %v31_v5, %v30_v2  ;;  %v126_v10 = vld [vmem:[%s739_s3] sm:$0xff]  ;;  %v127_v11 = vld [vmem:[%s739_s3 + $0x8] sm:$0xff]  ;;  %v128_v12 = vld [vmem:[%s739_s3 + $0x10] sm:$0xff]  ;;  %v458_v15 = vpack.c.bf16 %v33_v9, %v32_v8 }
   0x4   :  { %453 = vmatpush3.bf16.msra.mxu0 %v452_v4  ;;  %v129_v13 = vld [vmem:[%s739_s3 + $0x18] sm:$0xff]  ;;  %v471_v14 = vpack.c.bf16 %v127_v11, %v126_v10  ;;  %v34_v16 = vld [vmem:[%s737_s1 + $0x30] sm:$0xff]  ;;  %v130_v19 = vld [vmem:[%s739_s3 + $0x20] sm:$0xff] }
   0x5   :  { %454 = vmatprep.subr.bf16.mxu0 %v535_v3  ;;  %v35_v17 = vld [vmem:[%s737_s1 + $0x38] sm:$0xff]  ;;  %v474_v18 = vpack.c.bf16 %v129_v13, %v128_v12  ;;  %v131_v20 = vld [vmem:[%s739_s3 + $0x28] sm:$0xff] }
   0x6   :  { %472 = vmatpush3.bf16.msra.mxu1 %v471_v14 }
   0x7   :  { %473 = vmatprep.subr.bf16.mxu1 %v535_v3 }
   0x8   :  { %456 = vmatpush3.bf16.msra.mxu0 %v455_v7 }
   0x9   :  { %457 = vmatprep.subr.bf16.mxu0 %v535_v3 }
   0xa   :  { %12 = vsyncpa [#allocation3], 0  ;;  %v461_v21 = vpack.c.bf16 %v35_v17, %v34_v16  ;;  %v36_v22 = vld [vmem:[%s737_s1 + $0x40] sm:$0xff]  ;;  %v37_v23 = vld [vmem:[%s737_s1 + $0x48] sm:$0xff]  ;;  %475 = vmatpush3.bf16.msra.mxu1 %v474_v18  ;;  %v477_v24 = vpack.c.bf16 %v131_v20, %v130_v19  ;;  %vm51_vm1 = vcmask 1041408   ;;  %vm538_vm2 = vmmov 1  }
   0xb   :  { %476 = vmatprep.subr.bf16.mxu1 %v535_v3  ;;  %v132_v25 = vld [vmem:[%s739_s3 + $0x30] sm:$0xff]  ;;  %v133_v26 = vld [vmem:[%s739_s3 + $0x38] sm:$0xff]  ;;  %v464_v27 = vpack.c.bf16 %v37_v23, %v36_v22  ;;  %v134_v31 = vld [vmem:[%s739_s3 + $0x40] sm:$0xff]  ;;  %vm47_vm4 = vcmask 736256   ;;  %vm235_vm5 = vcmask 523264   ;;  %s539_s30 = smov [#allocation2]  }
   0xc   :  { %459 = vmatpush3.bf16.msra.mxu0 %v458_v15  ;;  %v38_v28 = vld [vmem:[%s737_s1 + $0x50] sm:$0xff]  ;;  %v39_v29 = vld [vmem:[%s737_s1 + $0x58] sm:$0x3]  ;;  %v480_v30 = vpack.c.bf16 %v133_v26, %v132_v25  ;;  %v135_v32 = vld [vmem:[%s739_s3 + $0x48] sm:$0xff]  ;;  %vm309_vm6 = vcmask 80896  }
   0xd   :  { %460 = vmatprep.subr.bf16.mxu0 %v535_v3  ;;  %v467_v33 = vpack.c.bf16 %v39_v29, %v38_v28  ;;  %vm468_vm3 = vmpackc.low %vm51_vm1, %vm538_vm2  ;;  %v483_v34 = vpack.c.bf16 %v135_v32, %v134_v31  ;;  %v136_v35 = vld [vmem:[%s739_s3 + $0x50] sm:$0xff]  ;;  %v137_v36 = vld [vmem:[%s739_s3 + $0x58] sm:$0xff] }
   0xe   :  { %478 = vmatpush3.bf16.msra.mxu1 %v477_v24  ;;  %v27_v37 = vld [vmem:[%s736_s0] sm:$0xff]  ;;  %v486_v38 = vpack.c.bf16 %v137_v36, %v136_v35  ;;  %v139_v40 = vld [vmem:[%s739_s3 + $0x68] sm:$0xff]  ;;  %v140_v42 = vld [vmem:[%s739_s3 + $0x70] sm:$0xff]  ;;  %s317_s0 = sshll.u32 %s539_s30, 4  ;;  %s318_s0 = int_to_ptr.vmem [resolvable:$true] %s317_s0 }
   0xf   :  { %479 = vmatprep.subr.bf16.mxu1 %v535_v3  ;;  %v138_v39 = vld [vmem:[%s739_s3 + $0x60] sm:$0xff]  ;;  %v141_v43 = vld [vmem:[%s739_s3 + $0x78] sm:$0xff]  ;;  %v221_v46 = vld [vmem:[%s741_s5 + $0x8] sm:$0xff]  ;;  %p516_p1 = scmp.lt.s32.totalorder %s318_s0, %s318_s0 }
  0x10   :  { %462 = vmatpush3.bf16.msra.mxu0 %v461_v21  ;;  %v489_v41 = vpack.c.bf16 %v139_v40, %v138_v39  ;;  %v492_v44 = vpack.c.bf16 %v141_v43, %v140_v42  ;;  %v220_v45 = vld [vmem:[%s741_s5] sm:$0xff]  ;;  %v222_v47 = vld [vmem:[%s741_s5 + $0x10] sm:$0xff]  ;;  %v223_v49 = vld [vmem:[%s741_s5 + $0x18] sm:$0xff] }
  0x11   :  { %463 = vmatprep.subr.bf16.mxu0 %v535_v3  ;;  %v495_v48 = vpack.c.bf16 %v221_v46, %v220_v45  ;;  %v498_v50 = vpack.c.bf16 %v223_v49, %v222_v47  ;;  %v224_v51 = vld [vmem:[%s741_s5 + $0x20] sm:$0xff]  ;;  %v225_v52 = vld [vmem:[%s741_s5 + $0x28] sm:$0xff]  ;;  %v226_v59 = vld [vmem:[%s741_s5 + $0x30] sm:$0xff] }
  0x12   :  { %481 = vmatpush3.bf16.msra.mxu1 %v480_v30  ;;  %v501_v53 = vpack.c.bf16 %v225_v52, %v224_v51  ;;  %v325_v54 = vld [vmem:[%s738_s2] ss:$0 sm:$0xff]  ;;  %v227_v60 = vld [vmem:[%s741_s5 + $0x38] sm:$0xff]  ;;  %s511_s5 = scalar_lea.vmem %s318_s0, 128 }
  0x13   :  { %482 = vmatprep.subr.bf16.mxu1 %v535_v3  ;;  %v504_v61 = vpack.c.bf16 %v227_v60, %v226_v59  ;;  %v328_v62 = vld [vmem:[%s740_s4] ss:$0 sm:$0xff]  ;;  %p512_p0 = scmp.ne.s32.totalorder %s318_s0, %s511_s5  ;;  %p517_p2 = scmp.lt.s32.totalorder %s511_s5, %s511_s5 }
  0x14   :  { %465 = vmatpush3.bf16.msra.mxu0 %v464_v27 }
  0x15   :  { %466 = vmatprep.subr.bf16.mxu0 %v535_v3  ;;  %p518_p3 = por %p517_p2, %p516_p1 }
  0x16   :  { %484 = vmatpush3.bf16.msra.mxu1 %v483_v34 }
  0x17   :  { %485 = vmatprep.subr.bf16.mxu1 %v535_v3  ;;  %p519_p4 = pnand %p518_p3, %p512_p0 }
  0x18   :  { %469 = vmatpush3.bf16.msk.msra.mxu0 %vm468_vm3, %v467_v33 }
  0x19   :  { %494 = vmatprep.subr.bf16.mxu0 %v535_v3 }
  0x1a   :  { %487 = vmatpush3.bf16.msra.mxu1 %v486_v38 }
  0x1b   :  { %395 = vmatmul.mubr.msk.f32.vlgmr.msra.gmra.mrb[0].mxu0 %vm47_vm4, %v27_v37  ;;  %488 = vmatprep.subr.bf16.mxu1 %v535_v3 }
  0x1c   :  { %448 = vmatprep.mubr.msk.f32.mxu0 %vm536_vm0, %v537_v6  ;;  %496 = vmatpush3.bf16.msra.mxu0 %v495_v48 }
  0x1d   :  { %497 = vmatprep.subr.bf16.mxu0 %v535_v3 }
  0x1e   :  { %490 = vmatpush3.bf16.msra.mxu1 %v489_v41 }
  0x1f   :  { %491 = vmatprep.subr.bf16.mxu1 %v535_v3 }
  0x20   :  { %499 = vmatpush3.bf16.msra.mxu0 %v498_v50 }
  0x21   :  { %500 = vmatprep.subr.bf16.mxu0 %v535_v3 }
  0x22   :  { %493 = vmatpush3.bf16.msra.mxu1 %v492_v44 }
  0x24   :  { %502 = vmatpush3.bf16.msra.mxu0 %v501_v53 }
  0x25   :  { %503 = vmatprep.subr.bf16.mxu0 %v535_v3  ;;  %v329_v3 = vld [vmem:[%s742_s6] ss:$0 sm:$0xff] }
  0x28   :  { %505 = vmatpush3.bf16.msra.mxu0 %v504_v61 }
  0xee   :  { %v121_v55 = vpop.f32.mrb[0].mxu0 }
  0xef   :  { %v122_v56 = vadd.f32 %v325_v54, %v121_v55  ;;  %v396_v57 = vpop.f32.mrb[1].mxu0 }
  0xf1   :  { %v125_v58 = vmax.f32 %v122_v56, 0.0 }
  0xf3   :  { %430 = vmatmul.mubr.f32.vlgmr.msra.gmra.mrb[0].mxu1 %v125_v58 }
 0x1c6   :  { %v215_v63 = vpop.f32.mrb[0].mxu1 }
 0x1c7   :  { %v216_v0 = vadd.f32 %v328_v62, %v215_v63  ;;  %v431_v1 = vpop.f32.mrb[1].mxu1 }
 0x1c9   :  { %v219_v2 = vmax.f32 %v216_v0, 0.0 }
 0x1cb   :  { %449 = vmatmul.mubr.msk.f32.vlgmr.msra.gmra.mrb[2].mxu0 %vm235_vm5, %v219_v2 }
 0x29e   :  { %v305_v4 = vpop.f32.mrb[2].mxu0 }
 0x29f   :  { %v306_v5 = vadd.f32 %v329_v3, %v305_v4  ;;  %v450_v6 = vpop.f32.mrb[3].mxu0 }
 0x2a1   :  { %310 = vst.msk [vmem:[#allocation2] sm:$0xff] %vm309_vm6, %v306_v5 }
 0x2a2   :  { %522 = shalt.err (!%p519_p4)
}
 0x2a3   :  { %s523_s9 = scalar_lea.hbm %s743_s7, 128 }
 0x2a4   :  { %p524_p5 = scmp.ne.s32.totalorder %s743_s7, %s523_s9  ;;  %p527_p6 = scmp.lt.u32.totalorder %s523_s9, %s743_s7 }
 0x2a6   :  { %p529_p7 = pnand %p527_p6, %p524_p5 }
 0x2a8   :  { %532 = shalt.err (!%p529_p7)
}
 0x2a9   :  { %320 = dma.vmem_to_hbm [thread:$0]  %s318_s0, 128, %s743_s7, [#allocation3]  }
 0x2aa   :  { %533 = dma.done.wait [#allocation3], 128  }
 0x2ab   :  { %534 = vsyncadd [#allocation3], 4294967168 }
 0x2ac   :  { %324 = vsyncpa [#allocation3], 1 }

</bundles_post_ra>
